<compile_context>
chip_gen: v6e
topology: v6e:2x2x1
jax: 0.10.0
libtpu: 0.0.40
codegen_flags: <defaults>
</compile_context>

<pallas_src>
import functools

import jax
import jax.numpy as jnp
from jax.experimental import pallas as pl
from jax.experimental.pallas import tpu as pltpu

LANES = 128                       # vreg lane width; stored last dim stays lane-dense
MAX_TILE_BYTES = 2 * 1024 * 1024  # 2 MiB/block: in+out x double-buffer = 8 MiB VMEM
MIN_ROWS_TO_SPLIT = 512           # < 256 KiB f32: splitting is pure per-step overhead


def _cdiv(a, b):
    return -(-a // b)


def _num_tensorcores():
    """2 on v7x (dual TensorCore), 1 on v5e/v6e.  Safe fallback: 1."""
    try:
        kind = jax.devices()[0].device_kind.lower()
    except Exception:
        return 1
    return 2 if "v7" in kind else 1


def _h_sigmoid_kernel(x_ref, o_ref, *, h_max):
    x = x_ref[...]
    # relu6(x + 3) * h_max / 6  -- single VPU pass over the tile.
    o_ref[...] = (jnp.minimum(jnp.maximum(x + 3.0, 0.0), 6.0)
                  * (h_max / 6.0)).astype(o_ref.dtype)


def h_sigmoid(x, h_max=1.0):
    """Elementwise h_sigmoid over an arbitrarily-shaped float array."""
    orig_shape = x.shape
    orig_dtype = x.dtype
    total = x.size
    if total == 0:
        return x

    itemsize = jnp.dtype(orig_dtype).itemsize
    # Dtype-aware sublane multiple: 8 (f32), 16 (bf16), 32 (int8/fp8).
    sub = 8 * max(1, 4 // itemsize)
    max_tile_rows = max(sub, (MAX_TILE_BYTES // (LANES * itemsize)) // sub * sub)

    rows = _cdiv(total, LANES)
    aligned = (total % LANES == 0)

    # Contiguous reshape only -- no transpose, and (fast path) no pad/slice.
    flat = x.reshape(-1)
    if not aligned:
        # Ragged tail: pad only up to the next lane multiple (< 128 elements).
        # TODO(synk): XLA still materializes this pad as a copy; a split
        # bulk+tail path would remove the extra HBM pass for ragged sizes.
        flat = jnp.pad(flat, (0, rows * LANES - total))
    x2d = flat.reshape(rows, LANES)

    # ---- generation-aware tiling -------------------------------------------
    num_tc = _num_tensorcores()
    cap_tiles = _cdiv(rows, max_tile_rows)          # tiles forced by the VMEM cap
    if num_tc > 1 and rows >= MIN_ROWS_TO_SPLIT:
        want = max(4, cap_tiles)                    # >= 2 pipelined steps per core
        want += want % 2                            # even => both cores balanced
    else:
        want = cap_tiles                            # single-TC: never split for free

    if want <= 1:
        # One block covering the full array: no (8,128) divisibility needed,
        # no per-step overhead, full unmasked vreg accesses.
        tile_rows, num_tiles = rows, 1
    else:
        tile_rows = min(max_tile_rows, _cdiv(_cdiv(rows, want), sub) * sub)
        tile_rows = max(sub, tile_rows)
        if tile_rows >= rows:                       # degenerate: fall back to 1 block
            tile_rows, num_tiles = rows, 1
        else:
            num_tiles = _cdiv(rows, tile_rows)      # last block masked by Pallas

    kernel = functools.partial(_h_sigmoid_kernel, h_max=float(h_max))

    out2d = pl.pallas_call(
        kernel,
        out_shape=jax.ShapeDtypeStruct(x2d.shape, orig_dtype),
        grid_spec=pltpu.PrefetchScalarGridSpec(
            num_scalar_prefetch=0,
            grid=(num_tiles,),
            in_specs=[pl.BlockSpec((tile_rows, LANES), lambda i: (i, 0))],
            out_specs=pl.BlockSpec((tile_rows, LANES), lambda i: (i, 0)),
        ),
        compiler_params=pltpu.CompilerParams(
            dimension_semantics=("parallel",)),
        cost_estimate=pl.CostEstimate(
            flops=4 * total,
            transcendentals=0,
            bytes_accessed=2 * total * itemsize),
    )(x2d)

    if aligned:
        return out2d.reshape(orig_shape)
    return out2d.reshape(-1)[:total].reshape(orig_shape)


def h_sigmoid_reference(x, h_max=1.0):
    """Pure-JAX reference mirroring the PyTorch forward."""
    return jnp.clip(x + 3.0, 0.0, 6.0) * (h_max / 6.0)


if __name__ == "__main__":
    key = jax.random.PRNGKey(0)
    H_MAX = 1.0

    # 1) Typical RPN feature map (N, C, H, W), f32, lane-aligned fast path.
    N, C, H, W = 2, 64, 16, 16
    k1, k2, k3 = jax.random.split(key, 3)
    x = jax.random.normal(k1, (N, C, H, W), jnp.float32) * 4.0  # straddle the knees
    out = h_sigmoid(x, h_max=H_MAX)
    jax.block_until_ready(out)
    ref = h_sigmoid_reference(x, h_max=H_MAX)
    assert out.shape == x.shape and out.dtype == x.dtype
    assert jnp.allclose(out, ref, rtol=1e-6, atol=1e-6)

    # 2) bf16 input (dtype-aware sublane rounding path).
    xb = (jax.random.normal(k2, (4, 32, 8, 8), jnp.float32) * 4.0).astype(jnp.bfloat16)
    outb = h_sigmoid(xb, h_max=H_MAX)
    jax.block_until_ready(outb)
    refb = h_sigmoid_reference(xb, h_max=H_MAX)
    assert outb.shape == xb.shape and outb.dtype == xb.dtype
    assert jnp.allclose(outb.astype(jnp.float32), refb.astype(jnp.float32),
                        rtol=2e-2, atol=2e-2)

    # 3) Ragged size (not a multiple of 128): tail-pad path.
    xr = jax.random.normal(k3, (3, 5, 7), jnp.float32) * 4.0
    outr = h_sigmoid(xr, h_max=H_MAX)
    jax.block_until_ready(outr)
    refr = h_sigmoid_reference(xr, h_max=H_MAX)
    assert outr.shape == xr.shape and outr.dtype == xr.dtype
    assert jnp.allclose(outr, refr, rtol=1e-6, atol=1e-6)

    print("KERNEL_OK")
</pallas_src>

<mosaic_0001>
module attributes {stable_mosaic.version = 11 : i64} {
  func.func @_h_sigmoid_kernel(%arg0: i32, %arg1: memref<256x128xf32, #tpu.memory_space<vmem>>, %arg2: memref<256x128xf32, #tpu.memory_space<vmem>>) attributes {dimension_semantics = [#tpu.dimension_semantics<parallel>], iteration_bounds = array<i64: 1>, scalar_prefetch = 0 : i64, scratch_operands = 0 : i64, tpu.core_type = #tpu.core_type<tc>, window_params = [{transform_indices = @transform_0, window_bounds = array<i64: 256, 128>}, {transform_indices = @transform_1, window_bounds = array<i64: 256, 128>}]} {
    %c0 = arith.constant 0 : index
    %c0_0 = arith.constant 0 : index
    %0 = vector.load %arg1[%c0, %c0_0] : memref<256x128xf32, #tpu.memory_space<vmem>>, vector<256x128xf32>
    %cst = arith.constant 3.000000e+00 : f32
    %1 = vector.broadcast %cst : f32 to vector<256x128xf32>
    %2 = arith.addf %0, %1 : vector<256x128xf32>
    %cst_1 = arith.constant 0.000000e+00 : f32
    %3 = vector.broadcast %cst_1 : f32 to vector<256x128xf32>
    %4 = arith.maximumf %2, %3 : vector<256x128xf32>
    %cst_2 = arith.constant 6.000000e+00 : f32
    %5 = vector.broadcast %cst_2 : f32 to vector<256x128xf32>
    %6 = arith.minimumf %4, %5 : vector<256x128xf32>
    %cst_3 = arith.constant 0.166666672 : f32
    %7 = vector.broadcast %cst_3 : f32 to vector<256x128xf32>
    %8 = arith.mulf %6, %7 : vector<256x128xf32>
    %c0_4 = arith.constant 0 : index
    %c0_5 = arith.constant 0 : index
    %9 = vector.load %arg2[%c0_4, %c0_5] : memref<256x128xf32, #tpu.memory_space<vmem>>, vector<256x128xf32>
    tpu.vector_store %arg2[%c0_4, %c0_5], %8 {strides = array<i32>} : memref<256x128xf32, #tpu.memory_space<vmem>>, vector<256x128xf32>,
    return
  }
  func.func @transform_0(%arg0: i32) -> (i32, i32) {
    %c0_i32 = arith.constant 0 : i32
    %c0_i32_0 = arith.constant 0 : i32
    return %arg0, %c0_i32 : i32, i32
  }
  func.func @transform_1(%arg0: i32) -> (i32, i32) {
    %c0_i32 = arith.constant 0 : i32
    %c0_i32_0 = arith.constant 0 : i32
    return %arg0, %c0_i32 : i32, i32
  }
}

</mosaic_0001>

<bundles_post_ra>
// kernel: tpu_custom_call.1
= control target key start
LH: loop header
LB: loop body
LE: loop exit
PB: predicated region body
PF: predicated region fallthrough
CT: control target
= control target key end

     0   :  { %6 = vsyncpa [#allocation3], 0  ;;  %s306_s0 = inlined_call_operand.hbm [shape: f32[256,128], index: 0, kind: input, shape index: {}]   ;;  %s307_s1 = inlined_call_operand.hbm [shape: f32[256,128], index: 1, kind: output, shape index: {}]  }
   0x1   :  { %7 = vsyncpa [#allocation4], 0  ;;  %s280_s6 = smov [#allocation2]  }
   0x2   :  { %s13_s7 = sshll.u32 %s280_s6, 4  ;;  %s14_s7 = int_to_ptr.vmem [resolvable:$true] %s13_s7 }
   0x3   :  { %s244_s8 = scalar_lea.vmem %s14_s7, 4096  ;;  %p249_p1 = scmp.lt.s32.totalorder %s14_s7, %s14_s7 }
   0x4   :  { %p245_p0 = scmp.ne.s32.totalorder %s14_s7, %s244_s8  ;;  %p250_p2 = scmp.lt.s32.totalorder %s244_s8, %s244_s8 }
   0x6   :  { %p251_p3 = por %p250_p2, %p249_p1 }
   0x8   :  { %p252_p4 = pnand %p251_p3, %p245_p0 }
   0xa   :  { %255 = shalt.err (!%p252_p4)
}
   0xb   :  { %s281_s9 = smov 128   ;;  %s282_s10 = smov 8  }
   0xc   :  { %19 = dma.hbm_to_vmem [thread:$0]  %s306_s0, 4096, %s14_s7, [#allocation3], %s281_s9, %s281_s9, %s282_s10  }
   0xd   :  { %276 = dma.done.wait [#allocation3], 4096  }
   0xe   :  { %277 = vsyncadd [#allocation3], 4294963200  ;;  %v23_v0 = vld [vmem:[#allocation2] sm:$0xff]  ;;  %v24_v1 = vld [vmem:[#allocation2 + $0x8] sm:$0xff]  ;;  %s283_s0 = smov [#allocation5]  }
   0xf   :  { %v25_v2 = vld [vmem:[#allocation2 + $0x10] sm:$0xff]  ;;  %v55_v3 = vadd.f32 3.0, %v23_v0  ;;  %v56_v4 = vadd.f32 3.0, %v24_v1  ;;  %v26_v6 = vld [vmem:[#allocation2 + $0x18] sm:$0xff]  ;;  %v27_v7 = vld [vmem:[#allocation2 + $0x20] sm:$0xff]  ;;  %s220_s13 = sshll.u32 %s283_s0, 4  ;;  %s221_s13 = int_to_ptr.vmem [resolvable:$true] %s220_s13 }
  0x10   :  { %v57_v5 = vadd.f32 3.0, %v25_v2  ;;  %v28_v8 = vld [vmem:[#allocation2 + $0x28] sm:$0xff]  ;;  %v58_v9 = vadd.f32 3.0, %v26_v6  ;;  %v59_v10 = vadd.f32 3.0, %v27_v7  ;;  %v29_v12 = vld [vmem:[#allocation2 + $0x30] sm:$0xff]  ;;  %v30_v13 = vld [vmem:[#allocation2 + $0x38] sm:$0xff]  ;;  %p261_p6 = scmp.lt.s32.totalorder %s221_s13, %s221_s13 }
  0x11   :  { %v60_v11 = vadd.f32 3.0, %v28_v8  ;;  %v87_v14 = vmax.f32 %v55_v3, 0.0  ;;  %v88_v15 = vmax.f32 %v56_v4, 0.0  ;;  %v61_v17 = vadd.f32 3.0, %v29_v12  ;;  %v31_v22 = vld [vmem:[#allocation2 + $0x40] sm:$0xff]  ;;  %v32_v23 = vld [vmem:[#allocation2 + $0x48] sm:$0xff] }
  0x12   :  { %v89_v16 = vmax.f32 %v57_v5, 0.0  ;;  %v90_v18 = vmax.f32 %v58_v9, 0.0  ;;  %v91_v19 = vmax.f32 %v59_v10, 0.0  ;;  %v62_v21 = vadd.f32 3.0, %v30_v13  ;;  %v33_v28 = vld [vmem:[#allocation2 + $0x50] sm:$0xff]  ;;  %v34_v29 = vld [vmem:[#allocation2 + $0x58] sm:$0xff] }
  0x13   :  { %v92_v20 = vmax.f32 %v60_v11, 0.0  ;;  %v119_v24 = vmin.f32 %v87_v14, 6.0  ;;  %v120_v25 = vmin.f32 %v88_v15, 6.0  ;;  %v93_v27 = vmax.f32 %v61_v17, 0.0  ;;  %v35_v34 = vld [vmem:[#allocation2 + $0x60] sm:$0xff]  ;;  %v36_v35 = vld [vmem:[#allocation2 + $0x68] sm:$0xff] }
  0x14   :  { %v121_v26 = vmin.f32 %v89_v16, 6.0  ;;  %v122_v30 = vmin.f32 %v90_v18, 6.0  ;;  %v123_v31 = vmin.f32 %v91_v19, 6.0  ;;  %v94_v33 = vmax.f32 %v62_v21, 0.0  ;;  %v37_v50 = vld [vmem:[#allocation2 + $0x70] sm:$0xff]  ;;  %v38_v51 = vld [vmem:[#allocation2 + $0x78] sm:$0xff] }
  0x15   :  { %v124_v32 = vmin.f32 %v92_v20, 6.0  ;;  %v151_v36 = vmul.f32 0.16666667, %v119_v24  ;;  %v152_v37 = vmul.f32 0.16666667, %v120_v25  ;;  %v125_v42 = vmin.f32 %v93_v27, 6.0 }
  0x16   :  { %v153_v38 = vmul.f32 0.16666667, %v121_v26  ;;  %v154_v39 = vmul.f32 0.16666667, %v122_v30  ;;  %v155_v40 = vmul.f32 0.16666667, %v123_v31 }
  0x17   :  { %v156_v41 = vmul.f32 0.16666667, %v124_v32  ;;  %183 = vst [vmem:[#allocation5] sm:$0xff] %v151_v36  ;;  %184 = vst [vmem:[#allocation5 + $0x8] sm:$0xff] %v152_v37  ;;  %v126_v43 = vmin.f32 %v94_v33, 6.0  ;;  %v63_v44 = vadd.f32 3.0, %v31_v22 }
  0x18   :  { %185 = vst [vmem:[#allocation5 + $0x10] sm:$0xff] %v153_v38  ;;  %v64_v45 = vadd.f32 3.0, %v32_v23  ;;  %186 = vst [vmem:[#allocation5 + $0x18] sm:$0xff] %v154_v39  ;;  %v65_v46 = vadd.f32 3.0, %v33_v28  ;;  %v66_v47 = vadd.f32 3.0, %v34_v29  ;;  %v67_v48 = vadd.f32 3.0, %v35_v34 }
  0x19   :  { %187 = vst [vmem:[#allocation5 + $0x20] sm:$0xff] %v155_v40  ;;  %188 = vst [vmem:[#allocation5 + $0x28] sm:$0xff] %v156_v41  ;;  %v68_v49 = vadd.f32 3.0, %v36_v35  ;;  %v157_v52 = vmul.f32 0.16666667, %v125_v42  ;;  %v95_v54 = vmax.f32 %v63_v44, 0.0 }
  0x1a   :  { %v158_v53 = vmul.f32 0.16666667, %v126_v43  ;;  %v96_v55 = vmax.f32 %v64_v45, 0.0  ;;  %v97_v56 = vmax.f32 %v65_v46, 0.0  ;;  %v98_v57 = vmax.f32 %v66_v47, 0.0  ;;  %v39_v60 = vld [vmem:[#allocation2 + $0x80] sm:$0xff] }
  0x1b   :  { %v99_v58 = vmax.f32 %v67_v48, 0.0  ;;  %v100_v59 = vmax.f32 %v68_v49, 0.0  ;;  %189 = vst [vmem:[#allocation5 + $0x30] sm:$0xff] %v157_v52  ;;  %v127_v61 = vmin.f32 %v95_v54, 6.0  ;;  %v69_v63 = vadd.f32 3.0, %v37_v50  ;;  %v40_v1 = vld [vmem:[#allocation2 + $0x88] sm:$0xff] }
  0x1c   :  { %190 = vst [vmem:[#allocation5 + $0x38] sm:$0xff] %v158_v53  ;;  %v128_v62 = vmin.f32 %v96_v55, 6.0  ;;  %v70_v0 = vadd.f32 3.0, %v38_v51  ;;  %v41_v2 = vld [vmem:[#allocation2 + $0x90] sm:$0xff]  ;;  %v42_v3 = vld [vmem:[#allocation2 + $0x98] sm:$0xff]  ;;  %v129_v4 = vmin.f32 %v97_v56, 6.0 }
  0x1d   :  { %v130_v5 = vmin.f32 %v98_v57, 6.0  ;;  %v131_v6 = vmin.f32 %v99_v58, 6.0  ;;  %v132_v7 = vmin.f32 %v100_v59, 6.0  ;;  %v43_v8 = vld [vmem:[#allocation2 + $0xa0] sm:$0xff]  ;;  %v44_v9 = vld [vmem:[#allocation2 + $0xa8] sm:$0xff]  ;;  %v101_v12 = vmax.f32 %v69_v63, 0.0 }
  0x1e   :  { %v159_v10 = vmul.f32 0.16666667, %v127_v61  ;;  %v160_v11 = vmul.f32 0.16666667, %v128_v62  ;;  %v102_v13 = vmax.f32 %v70_v0, 0.0  ;;  %v71_v20 = vadd.f32 3.0, %v39_v60 }
  0x1f   :  { %v161_v14 = vmul.f32 0.16666667, %v129_v4  ;;  %v162_v15 = vmul.f32 0.16666667, %v130_v5  ;;  %v163_v16 = vmul.f32 0.16666667, %v131_v6 }
  0x20   :  { %191 = vst [vmem:[#allocation5 + $0x40] sm:$0xff] %v159_v10  ;;  %192 = vst [vmem:[#allocation5 + $0x48] sm:$0xff] %v160_v11  ;;  %v164_v17 = vmul.f32 0.16666667, %v132_v7  ;;  %v133_v18 = vmin.f32 %v101_v12, 6.0  ;;  %v134_v19 = vmin.f32 %v102_v13, 6.0 }
  0x21   :  { %193 = vst [vmem:[#allocation5 + $0x50] sm:$0xff] %v161_v14  ;;  %194 = vst [vmem:[#allocation5 + $0x58] sm:$0xff] %v162_v15  ;;  %v72_v21 = vadd.f32 3.0, %v40_v1  ;;  %v73_v22 = vadd.f32 3.0, %v41_v2  ;;  %v74_v23 = vadd.f32 3.0, %v42_v3  ;;  %v75_v24 = vadd.f32 3.0, %v43_v8 }
  0x22   :  { %195 = vst [vmem:[#allocation5 + $0x60] sm:$0xff] %v163_v16  ;;  %v45_v25 = vld [vmem:[#allocation2 + $0xb0] sm:$0xff]  ;;  %v46_v26 = vld [vmem:[#allocation2 + $0xb8] sm:$0xff]  ;;  %196 = vst [vmem:[#allocation5 + $0x68] sm:$0xff] %v164_v17  ;;  %v165_v27 = vmul.f32 0.16666667, %v133_v18 }
  0x23   :  { %v166_v28 = vmul.f32 0.16666667, %v134_v19  ;;  %v103_v29 = vmax.f32 %v71_v20, 0.0  ;;  %v76_v30 = vadd.f32 3.0, %v44_v9  ;;  %v104_v31 = vmax.f32 %v72_v21, 0.0  ;;  %v47_v39 = vld [vmem:[#allocation2 + $0xc0] sm:$0xff] }
  0x24   :  { %v105_v32 = vmax.f32 %v73_v22, 0.0  ;;  %v106_v33 = vmax.f32 %v74_v23, 0.0  ;;  %v107_v34 = vmax.f32 %v75_v24, 0.0  ;;  %197 = vst [vmem:[#allocation5 + $0x70] sm:$0xff] %v165_v27  ;;  %v77_v37 = vadd.f32 3.0, %v45_v25  ;;  %v48_v40 = vld [vmem:[#allocation2 + $0xc8] sm:$0xff] }
  0x25   :  { %198 = vst [vmem:[#allocation5 + $0x78] sm:$0xff] %v166_v28  ;;  %v135_v35 = vmin.f32 %v103_v29, 6.0  ;;  %v108_v36 = vmax.f32 %v76_v30, 0.0  ;;  %v78_v38 = vadd.f32 3.0, %v46_v26  ;;  %v49_v41 = vld [vmem:[#allocation2 + $0xd0] sm:$0xff]  ;;  %v136_v42 = vmin.f32 %v104_v31, 6.0 }
  0x26   :  { %v137_v43 = vmin.f32 %v105_v32, 6.0  ;;  %v138_v44 = vmin.f32 %v106_v33, 6.0  ;;  %v139_v45 = vmin.f32 %v107_v34, 6.0  ;;  %v50_v46 = vld [vmem:[#allocation2 + $0xd8] sm:$0xff]  ;;  %v51_v47 = vld [vmem:[#allocation2 + $0xe0] sm:$0xff]  ;;  %v109_v50 = vmax.f32 %v77_v37, 0.0 }
  0x27   :  { %v167_v48 = vmul.f32 0.16666667, %v135_v35  ;;  %v140_v49 = vmin.f32 %v108_v36, 6.0  ;;  %v110_v51 = vmax.f32 %v78_v38, 0.0  ;;  %v52_v52 = vld [vmem:[#allocation2 + $0xe8] sm:$0xff]  ;;  %v79_v60 = vadd.f32 3.0, %v47_v39 }
  0x28   :  { %v168_v53 = vmul.f32 0.16666667, %v136_v42  ;;  %v169_v54 = vmul.f32 0.16666667, %v137_v43  ;;  %v170_v55 = vmul.f32 0.16666667, %v138_v44 }
  0x29   :  { %199 = vst [vmem:[#allocation5 + $0x80] sm:$0xff] %v167_v48  ;;  %v171_v56 = vmul.f32 0.16666667, %v139_v45  ;;  %v172_v57 = vmul.f32 0.16666667, %v140_v49  ;;  %v141_v58 = vmin.f32 %v109_v50, 6.0 }
  0x2a   :  { %v142_v59 = vmin.f32 %v110_v51, 6.0  ;;  %200 = vst [vmem:[#allocation5 + $0x88] sm:$0xff] %v168_v53  ;;  %201 = vst [vmem:[#allocation5 + $0x90] sm:$0xff] %v169_v54  ;;  %v80_v61 = vadd.f32 3.0, %v48_v40  ;;  %v81_v62 = vadd.f32 3.0, %v49_v41  ;;  %v82_v63 = vadd.f32 3.0, %v50_v46 }
  0x2b   :  { %202 = vst [vmem:[#allocation5 + $0x98] sm:$0xff] %v170_v55  ;;  %v53_v0 = vld [vmem:[#allocation2 + $0xf0] sm:$0xff]  ;;  %v54_v1 = vld [vmem:[#allocation2 + $0xf8] sm:$0xff]  ;;  %203 = vst [vmem:[#allocation5 + $0xa0] sm:$0xff] %v171_v56  ;;  %v173_v2 = vmul.f32 0.16666667, %v141_v58 }
  0x2c   :  { %204 = vst [vmem:[#allocation5 + $0xa8] sm:$0xff] %v172_v57  ;;  %v174_v3 = vmul.f32 0.16666667, %v142_v59  ;;  %v83_v4 = vadd.f32 3.0, %v51_v47  ;;  %v84_v5 = vadd.f32 3.0, %v52_v52  ;;  %v111_v6 = vmax.f32 %v79_v60, 0.0 }
  0x2d   :  { %v112_v7 = vmax.f32 %v80_v61, 0.0  ;;  %v113_v8 = vmax.f32 %v81_v62, 0.0  ;;  %v114_v9 = vmax.f32 %v82_v63, 0.0  ;;  %205 = vst [vmem:[#allocation5 + $0xb0] sm:$0xff] %v173_v2  ;;  %v85_v12 = vadd.f32 3.0, %v53_v0  ;;  %s256_s14 = scalar_lea.vmem %s221_s13, 4096 }
  0x2e   :  { %206 = vst [vmem:[#allocation5 + $0xb8] sm:$0xff] %v174_v3  ;;  %v115_v10 = vmax.f32 %v83_v4, 0.0  ;;  %v116_v11 = vmax.f32 %v84_v5, 0.0  ;;  %v86_v13 = vadd.f32 3.0, %v54_v1  ;;  %v143_v14 = vmin.f32 %v111_v6, 6.0  ;;  %p257_p5 = scmp.ne.s32.totalorder %s221_s13, %s256_s14  ;;  %p262_p7 = scmp.lt.s32.totalorder %s256_s14, %s256_s14 }
  0x2f   :  { %v144_v15 = vmin.f32 %v112_v7, 6.0  ;;  %v145_v16 = vmin.f32 %v113_v8, 6.0  ;;  %v146_v17 = vmin.f32 %v114_v9, 6.0  ;;  %v117_v20 = vmax.f32 %v85_v12, 0.0 }
  0x30   :  { %v147_v18 = vmin.f32 %v115_v10, 6.0  ;;  %v148_v19 = vmin.f32 %v116_v11, 6.0  ;;  %v118_v21 = vmax.f32 %v86_v13, 0.0  ;;  %v175_v22 = vmul.f32 0.16666667, %v143_v14  ;;  %p263_p8 = por %p262_p7, %p261_p6 }
  0x31   :  { %v176_v23 = vmul.f32 0.16666667, %v144_v15  ;;  %v177_v24 = vmul.f32 0.16666667, %v145_v16  ;;  %v178_v25 = vmul.f32 0.16666667, %v146_v17 }
  0x32   :  { %v179_v26 = vmul.f32 0.16666667, %v147_v18  ;;  %v180_v27 = vmul.f32 0.16666667, %v148_v19  ;;  %207 = vst [vmem:[#allocation5 + $0xc0] sm:$0xff] %v175_v22  ;;  %v149_v28 = vmin.f32 %v117_v20, 6.0  ;;  %p264_p9 = pnand %p263_p8, %p257_p5 }
  0x33   :  { %208 = vst [vmem:[#allocation5 + $0xc8] sm:$0xff] %v176_v23  ;;  %209 = vst [vmem:[#allocation5 + $0xd0] sm:$0xff] %v177_v24  ;;  %v150_v29 = vmin.f32 %v118_v21, 6.0 }
  0x34   :  { %210 = vst [vmem:[#allocation5 + $0xd8] sm:$0xff] %v178_v25  ;;  %211 = vst [vmem:[#allocation5 + $0xe0] sm:$0xff] %v179_v26  ;;  %v181_v30 = vmul.f32 0.16666667, %v149_v28 }
  0x35   :  { %212 = vst [vmem:[#allocation5 + $0xe8] sm:$0xff] %v180_v27  ;;  %v182_v31 = vmul.f32 0.16666667, %v150_v29 }
  0x36   :  { %213 = vst [vmem:[#allocation5 + $0xf0] sm:$0xff] %v181_v30 }
  0x37   :  { %214 = vst [vmem:[#allocation5 + $0xf8] sm:$0xff] %v182_v31 }
  0x38   :  { %267 = shalt.err (!%p264_p9)
}
  0x39   :  { %226 = dma.vmem_to_hbm [thread:$0]  %s221_s13, 4096, %s307_s1, [#allocation4], %s281_s9, %s281_s9, %s282_s10  }
  0x3a   :  { %278 = dma.done.wait [#allocation4], 4096  }
  0x3b   :  { %279 = vsyncadd [#allocation4], 4294963200 }
  0x3c   :  { %230 = vsyncpa [#allocation3], 1 }
  0x3d   :  { %231 = vsyncpa [#allocation4], 1 }

</bundles_post_ra>
